<compile_context>
chip_gen: v7x
topology: tpu7x:2x2x1
jax: 0.10.0
libtpu: 0.0.40
codegen_flags: <defaults>
</compile_context>

<pallas_src>
import math
import functools

import jax
import jax.numpy as jnp
from jax.experimental import pallas as pl
from jax.experimental.pallas import tpu as pltpu


def _arcface_kernel(cos_ref, tcos_ref, loss_ref, l_sc,
                    *, s, cos_m, sin_m, th, mm, num_classes, mask_classes):
    """One (tb, tc) tile of cosine logits; streaming sum-of-exp over class tiles.

    Uses a fixed logsumexp shift of `s` (valid because s*cosine <= s), so the
    only full-tile work is one exp (EUP) and one lane reduction (XLU).
    """
    j = pl.program_id(1)                       # class-tile index (innermost)

    @pl.when(j == 0)
    def _init():
        l_sc[...] = jnp.zeros_like(l_sc)

    cosine = cos_ref[...].astype(jnp.float32)  # (tb, tc)
    tb, tc = cosine.shape
    x = cosine * s - s                         # s*cos - s  (<= 0 for real lanes)

    if mask_classes:                           # static: only when C % tc != 0
        class_idx = jax.lax.broadcasted_iota(jnp.int32, (tb, tc), 1) + j * tc
        x = jnp.where(class_idx < num_classes, x, -1.0e30)   # exp -> exactly 0

    l_sc[...] += jnp.sum(jnp.exp(x), axis=-1, keepdims=True)

    @pl.when(j == pl.num_programs(1) - 1)
    def _finalize():
        # ArcFace margin only on the (resident) target-cosine column.
        cos_t = tcos_ref[...]                                   # (tb, 1) f32
        sine = jnp.sqrt(jnp.clip(1.0 - cos_t * cos_t, 0.0, 1.0))
        phi = cos_t * cos_m - sine * sin_m
        phi = jnp.where(cos_t > th, phi, cos_t - mm)

        exp_t = jnp.exp(s * cos_t - s)
        exp_phi = jnp.exp(s * phi - s)
        # Swap the unmargined target term for the margined one.  Floor guards
        # against catastrophic cancellation when the target class dominates
        # the softmax (corrected sum is mathematically >= exp_phi > 0).
        l_corr = l_sc[...] - exp_t + exp_phi
        l_corr = jnp.maximum(l_corr, jnp.maximum(exp_phi, 1e-37))
        lse = s + jnp.log(l_corr)
        loss_ref[...] = lse - s * phi          # per-sample CE (reduction='none')


def _round_up(x, m):
    return (x + m - 1) // m * m


def _arch_config():
    """Per-generation block-byte cap / scoped-VMEM limit / megacore split."""
    try:
        kind = jax.devices()[0].device_kind.lower()
    except Exception:
        kind = ""
    if "v6" in kind:
        # 128 MiB physical VMEM: big blocks, raise the scoped limit explicitly.
        return {"block_cap": 14 << 20, "vmem_limit": 64 << 20, "split_batch": False}
    if "v7" in kind or "7x" in kind:
        # 64 MiB physical VMEM per TC, 2 TCs: smaller cap, keep headroom,
        # guarantee >=2 batch blocks so both cores get work.
        return {"block_cap": 10 << 20, "vmem_limit": 28 << 20, "split_batch": True}
    # v5e / v5p / v4 / unknown: conservative (v5e scoped default is 16 MiB).
    return {"block_cap": 4 << 20, "vmem_limit": None, "split_batch": False}


def _auto_tiles(B, C, itemsize, block_cap, split_batch):
    """Largest lane-dense (tb, tc) tile of the *input dtype* within block_cap.

    Blocks are double-buffered by the pipeline, so block_cap is ~half the VMEM
    spent on the cosine input.
    """
    sub = 16 if itemsize == 2 else 8           # bf16 packs 16 rows per sublane
    tc = min(_round_up(C, 128), 4096)
    max_tb = max(sub, (block_cap // (tc * itemsize)) // sub * sub)
    tb = min(_round_up(B, sub), 1024, max_tb)
    if split_batch and B > sub:
        # At least two blocks along the 'parallel' batch axis (dual TC).
        tb = min(tb, max(sub, _round_up(-(-B // 2), sub)))
    return tb, tc


def arcface_loss(cosine, label, *, s=45.0, m=0.5, block_b=None, block_c=None):
    """cosine: (B, C) float32/bfloat16, label: (B,) int. Returns scalar mean loss."""
    B, C = cosine.shape
    itemsize = jnp.dtype(cosine.dtype).itemsize
    cfg = _arch_config()

    tb_auto, tc_auto = _auto_tiles(B, C, itemsize, cfg["block_cap"], cfg["split_batch"])
    tb = int(block_b) if block_b is not None else tb_auto
    tc = int(block_c) if block_c is not None else tc_auto
    sub = 16 if itemsize == 2 else 8
    assert tb % sub == 0 and tc % 128 == 0, (tb, tc)

    # Target cosine gathered outside the kernel (tiny B-element XLA gather);
    # removes all one-hot work from the streaming inner loop.
    labels = label.astype(jnp.int32)
    tcos = jnp.take_along_axis(cosine, labels[:, None], axis=-1).astype(jnp.float32)

    kernel = functools.partial(
        _arcface_kernel,
        s=float(s),
        cos_m=float(math.cos(m)),
        sin_m=float(math.sin(m)),
        th=float(math.cos(math.pi - m)),
        mm=float(math.sin(math.pi - m) * m),
        num_classes=C,
        mask_classes=(C % tc != 0),
    )

    per_sample = pl.pallas_call(
        kernel,
        out_shape=jax.ShapeDtypeStruct((B, 1), jnp.float32),
        grid_spec=pltpu.PrefetchScalarGridSpec(
            num_scalar_prefetch=0,
            grid=(pl.cdiv(B, tb), pl.cdiv(C, tc)),   # class (reduction) axis last
            in_specs=[
                pl.BlockSpec((tb, tc), lambda i, j: (i, j)),
                pl.BlockSpec((tb, 1), lambda i, j: (i, 0)),   # target cos resident
            ],
            out_specs=pl.BlockSpec((tb, 1), lambda i, j: (i, 0)),
            scratch_shapes=[pltpu.VMEM((tb, 1), jnp.float32)],  # running sum-exp
        ),
        compiler_params=pltpu.CompilerParams(
            dimension_semantics=("parallel", "arbitrary"),
            vmem_limit_bytes=cfg["vmem_limit"]),
        cost_estimate=pl.CostEstimate(
            flops=3 * B * C + 16 * B,
            transcendentals=B * C + 3 * B,
            bytes_accessed=B * C * itemsize + 12 * B),
    )(cosine, tcos)

    return jnp.mean(per_sample)                 # all rows are real (no padding)


def _reference(cosine, label, *, s=45.0, m=0.5):
    """Pure-JAX reference mirroring the PyTorch ArcFaceLoss forward."""
    cosine = cosine.astype(jnp.float32)
    cos_m, sin_m = math.cos(m), math.sin(m)
    th, mm = math.cos(math.pi - m), math.sin(math.pi - m) * m
    sine = jnp.sqrt(jnp.clip(1.0 - cosine * cosine, 0.0, 1.0))
    phi = cosine * cos_m - sine * sin_m
    phi = jnp.where(cosine > th, phi, cosine - mm)
    one_hot = jax.nn.one_hot(label, cosine.shape[-1], dtype=cosine.dtype)
    output = (one_hot * phi + (1.0 - one_hot) * cosine) * s
    lse = jax.scipy.special.logsumexp(output, axis=-1)
    per_sample = lse - jnp.take_along_axis(output, label[:, None], axis=-1)[:, 0]
    return jnp.mean(per_sample)


if __name__ == "__main__":
    B, C = 50, 500          # deliberately NOT multiples of 8 / 128 (ragged path)
    key = jax.random.PRNGKey(0)
    k1, k2 = jax.random.split(key)
    cosine = jax.random.uniform(k1, (B, C), jnp.float32, minval=-1.0, maxval=1.0)
    label = jax.random.randint(k2, (B,), 0, C, dtype=jnp.int32)

    ref = jax.block_until_ready(_reference(cosine, label))

    # Small explicit tiles: exercises batch tiling, streaming class-axis
    # sum-exp across 4 class blocks, and ragged row/column masking.
    out_tiled = jax.block_until_ready(
        arcface_loss(cosine, label, block_b=16, block_c=128))
    assert jnp.allclose(out_tiled, ref, rtol=1e-4, atol=1e-4), (out_tiled, ref)

    # Auto-tiled (production) path: architecture-sized lane-dense tile.
    out_auto = jax.block_until_ready(arcface_loss(cosine, label))
    assert jnp.allclose(out_auto, ref, rtol=1e-4, atol=1e-4), (out_auto, ref)

    print("KERNEL_OK")
</pallas_src>

<mosaic_0001>
module attributes {stable_mosaic.version = 11 : i64} {
  func.func @_arcface_kernel(%arg0: i32, %arg1: i32, %arg2: memref<16x128xf32, #tpu.memory_space<vmem>>, %arg3: memref<16x1xf32, #tpu.memory_space<vmem>>, %arg4: memref<16x1xf32, #tpu.memory_space<vmem>>, %arg5: memref<16x1xf32, #tpu.memory_space<vmem>>) attributes {dimension_semantics = [#tpu.dimension_semantics<parallel>, #tpu.dimension_semantics<arbitrary>], iteration_bounds = array<i64: 4, 4>, scalar_prefetch = 0 : i64, scratch_operands = 1 : i64, tpu.core_type = #tpu.core_type<tc>, window_params = [{transform_indices = @transform_0, window_bounds = array<i64: 16, 128>}, {transform_indices = @transform_1, window_bounds = array<i64: 16, 1>}, {transform_indices = @transform_2, window_bounds = array<i64: 16, 1>}]} {
    %c0_i32 = arith.constant 0 : i32
    %0 = arith.cmpi eq, %arg1, %c0_i32 : i32
    %1 = arith.extui %0 : i1 to i32
    %c0_i32_0 = arith.constant 0 : i32
    %2 = arith.cmpi ne, %1, %c0_i32_0 : i32
    scf.if %2 {
      %cst_10 = arith.constant 0.000000e+00 : f32
      %25 = vector.broadcast %cst_10 : f32 to vector<16x1xf32>
      %c0_11 = arith.constant 0 : index
      %c0_12 = arith.constant 0 : index
      %26 = vector.load %arg5[%c0_11, %c0_12] : memref<16x1xf32, #tpu.memory_space<vmem>>, vector<16x1xf32>
      tpu.vector_store %arg5[%c0_11, %c0_12], %25 {strides = array<i32>} : memref<16x1xf32, #tpu.memory_space<vmem>>, vector<16x1xf32>,
    } else {
    }
    %c0 = arith.constant 0 : index
    %c0_1 = arith.constant 0 : index
    %3 = vector.load %arg2[%c0, %c0_1] : memref<16x128xf32, #tpu.memory_space<vmem>>, vector<16x128xf32>
    %cst = arith.constant 4.500000e+01 : f32
    %4 = vector.broadcast %cst : f32 to vector<16x128xf32>
    %5 = arith.mulf %3, %4 : vector<16x128xf32>
    %cst_2 = arith.constant 4.500000e+01 : f32
    %6 = vector.broadcast %cst_2 : f32 to vector<16x128xf32>
    %7 = arith.subf %5, %6 : vector<16x128xf32>
    %8 = tpu.iota {dimensions = array<i32: 1>} : vector<16x128xi32>
    %c128_i32 = arith.constant 128 : i32
    %9 = arith.muli %arg1, %c128_i32 : i32
    %10 = vector.broadcast %9 : i32 to vector<16x128xi32>
    %11 = arith.addi %8, %10 : vector<16x128xi32>
    %c500_i32 = arith.constant 500 : i32
    %12 = vector.broadcast %c500_i32 : i32 to vector<16x128xi32>
    %13 = arith.cmpi slt, %11, %12 : vector<16x128xi32>
    %cst_3 = arith.constant -1.000000e+30 : f32
    %14 = vector.broadcast %cst_3 : f32 to vector<16x128xf32>
    %15 = arith.select %13, %7, %14 : vector<16x128xi1>, vector<16x128xf32>
    %c0_4 = arith.constant 0 : index
    %c0_5 = arith.constant 0 : index
    %16 = vector.load %arg5[%c0_4, %c0_5] : memref<16x1xf32, #tpu.memory_space<vmem>>, vector<16x1xf32>
    %17 = math.exp %15 : vector<16x128xf32>
    %cst_6 = arith.constant dense<0.000000e+00> : vector<16xf32>
    %18 = vector.multi_reduction <add>, %17, %cst_6 [1] : vector<16x128xf32> to vector<16xf32>
    %19 = vector.shape_cast %18 : vector<16xf32> to vector<16x1xf32>
    %20 = arith.addf %16, %19 : vector<16x1xf32>
    %c0_7 = arith.constant 0 : index
    %c0_8 = arith.constant 0 : index
    %21 = vector.load %arg5[%c0_7, %c0_8] : memref<16x1xf32, #tpu.memory_space<vmem>>, vector<16x1xf32>
    tpu.vector_store %arg5[%c0_7, %c0_8], %20 {strides = array<i32>} : memref<16x1xf32, #tpu.memory_space<vmem>>, vector<16x1xf32>,
    %c3_i32 = arith.constant 3 : i32
    %22 = arith.cmpi eq, %arg1, %c3_i32 : i32
    %23 = arith.extui %22 : i1 to i32
    %c0_i32_9 = arith.constant 0 : i32
    %24 = arith.cmpi ne, %23, %c0_i32_9 : i32
    scf.if %24 {
      %c0_10 = arith.constant 0 : index
      %c0_11 = arith.constant 0 : index
      %25 = vector.load %arg3[%c0_10, %c0_11] : memref<16x1xf32, #tpu.memory_space<vmem>>, vector<16x1xf32>
      %26 = arith.mulf %25, %25 : vector<16x1xf32>
      %cst_12 = arith.constant 1.000000e+00 : f32
      %27 = vector.broadcast %cst_12 : f32 to vector<16x1xf32>
      %28 = arith.subf %27, %26 : vector<16x1xf32>
      %cst_13 = arith.constant 0.000000e+00 : f32
      %cst_14 = arith.constant 1.000000e+00 : f32
      %29 = vector.broadcast %cst_13 : f32 to vector<16x1xf32>
      %30 = arith.maximumf %29, %28 : vector<16x1xf32>
      %31 = vector.broadcast %cst_14 : f32 to vector<16x1xf32>
      %32 = arith.minimumf %31, %30 : vector<16x1xf32>
      %33 = math.sqrt %32 : vector<16x1xf32>
      %cst_15 = arith.constant 0.87758255 : f32
      %34 = vector.broadcast %cst_15 : f32 to vector<16x1xf32>
      %35 = arith.mulf %25, %34 : vector<16x1xf32>
      %cst_16 = arith.constant 0.47942555 : f32
      %36 = vector.broadcast %cst_16 : f32 to vector<16x1xf32>
      %37 = arith.mulf %33, %36 : vector<16x1xf32>
      %38 = arith.subf %35, %37 : vector<16x1xf32>
      %cst_17 = arith.constant -0.87758255 : f32
      %39 = vector.broadcast %cst_17 : f32 to vector<16x1xf32>
      %40 = arith.cmpf ogt, %25, %39 : vector<16x1xf32>
      %cst_18 = arith.constant 0.239712775 : f32
      %41 = vector.broadcast %cst_18 : f32 to vector<16x1xf32>
      %42 = arith.subf %25, %41 : vector<16x1xf32>
      %43 = arith.select %40, %38, %42 : vector<16x1xi1>, vector<16x1xf32>
      %cst_19 = arith.constant 4.500000e+01 : f32
      %44 = vector.broadcast %cst_19 : f32 to vector<16x1xf32>
      %45 = arith.mulf %44, %25 : vector<16x1xf32>
      %cst_20 = arith.constant 4.500000e+01 : f32
      %46 = vector.broadcast %cst_20 : f32 to vector<16x1xf32>
      %47 = arith.subf %45, %46 : vector<16x1xf32>
      %48 = math.exp %47 : vector<16x1xf32>
      %cst_21 = arith.constant 4.500000e+01 : f32
      %49 = vector.broadcast %cst_21 : f32 to vector<16x1xf32>
      %50 = arith.mulf %49, %43 : vector<16x1xf32>
      %cst_22 = arith.constant 4.500000e+01 : f32
      %51 = vector.broadcast %cst_22 : f32 to vector<16x1xf32>
      %52 = arith.subf %50, %51 : vector<16x1xf32>
      %53 = math.exp %52 : vector<16x1xf32>
      %c0_23 = arith.constant 0 : index
      %c0_24 = arith.constant 0 : index
      %54 = vector.load %arg5[%c0_23, %c0_24] : memref<16x1xf32, #tpu.memory_space<vmem>>, vector<16x1xf32>
      %55 = arith.subf %54, %48 : vector<16x1xf32>
      %56 = arith.addf %55, %53 : vector<16x1xf32>
      %cst_25 = arith.constant 9.99999991E-38 : f32
      %57 = vector.broadcast %cst_25 : f32 to vector<16x1xf32>
      %58 = arith.maximumf %53, %57 : vector<16x1xf32>
      %59 = arith.maximumf %56, %58 : vector<16x1xf32>
      %60 = math.log %59 : vector<16x1xf32>
      %cst_26 = arith.constant 4.500000e+01 : f32
      %61 = vector.broadcast %cst_26 : f32 to vector<16x1xf32>
      %62 = arith.addf %61, %60 : vector<16x1xf32>
      %cst_27 = arith.constant 4.500000e+01 : f32
      %63 = vector.broadcast %cst_27 : f32 to vector<16x1xf32>
      %64 = arith.mulf %63, %43 : vector<16x1xf32>
      %65 = arith.subf %62, %64 : vector<16x1xf32>
      %c0_28 = arith.constant 0 : index
      %c0_29 = arith.constant 0 : index
      %66 = vector.load %arg4[%c0_28, %c0_29] : memref<16x1xf32, #tpu.memory_space<vmem>>, vector<16x1xf32>
      tpu.vector_store %arg4[%c0_28, %c0_29], %65 {strides = array<i32>} : memref<16x1xf32, #tpu.memory_space<vmem>>, vector<16x1xf32>,
    } else {
    }
    return
  }
  func.func @transform_0(%arg0: i32, %arg1: i32) -> (i32, i32) {
    %c0_i32 = arith.constant 0 : i32
    return %arg0, %arg1 : i32, i32
  }
  func.func @transform_1(%arg0: i32, %arg1: i32) -> (i32, i32) {
    %c0_i32 = arith.constant 0 : i32
    %c0_i32_0 = arith.constant 0 : i32
    return %arg0, %c0_i32 : i32, i32
  }
  func.func @transform_2(%arg0: i32, %arg1: i32) -> (i32, i32) {
    %c0_i32 = arith.constant 0 : i32
    %c0_i32_0 = arith.constant 0 : i32
    return %arg0, %c0_i32 : i32, i32
  }
}

</mosaic_0001>

<bundles_post_ra>
// kernel: tpu_custom_call.1
= control target key start
LH: loop header
LB: loop body
LE: loop exit
PB: predicated region body
PF: predicated region fallthrough
CT: control target
= control target key end

     0   :  { %7 = vsyncpa [#allocation4], 0  ;;  %s1237_s0 = inlined_call_operand.hbm [shape: f32[50,500], index: 0, kind: input, shape index: {}]   ;;  %s1238_s1 = inlined_call_operand.vmem [shape: f32[50,1], index: 1, kind: input, shape index: {}]   ;;  %s1239_s2 = inlined_call_operand.vmem [shape: f32[50,1], index: 2, kind: output, shape index: {}]  }
   0x1   :  { %9 = vsyncpa [#allocation4 + $0x1], 0  ;;  %s1013_s9 = smov 0   ;;  %s1015_s10 = smov 0  }
   0x2   :  { %s1017_s11 = smov 0   ;;  %s1019_s12 = smov 0  }
   0x3   :  { %s1021_s13 = smov 0   ;;  %s1023_s14 = smov 0  }
   0x4   :  { %s1025_s15 = smov 0   ;;  %s1027_s16 = smov 0  }
   0x5   :  { %s1029_s17 = smov 0   ;;  %s1031_s18 = smov 0  }
   0x6 LB: > { %s599_s19 = sadd.s32 4294967295, %s959_s18   ;;  %s24_s20 = sadd.s32 1, %s951_s16  ;;  %s959_s18 = sphi %s1031_s18, %s15_s18   ;;  %s955_s17 = sphi %s1029_s17, %s1251_s17   ;;  %s951_s16 = sphi %s1027_s16, %s1250_s16   ;;  %s947_s15 = sphi %s1025_s15, %s1249_s15   ;;  %s943_s14 = sphi %s1023_s14, %s1248_s14   ;;  %s939_s13 = sphi %s1021_s13, %s1247_s13   ;;  %s935_s12 = sphi %s1019_s12, %s1246_s12   ;;  %s931_s11 = sphi %s1017_s11, %s1245_s11   ;;  %s927_s10 = sphi %s1015_s10, %s1244_s10   ;;  %s923_s9 = sphi %s1013_s9, %s1243_s9  }
   0x7   : > { %p25_p0 = scmp.ge.s32.totalorder %s24_s20, 4  ;;  %s27_s21 = sadd.s32 1, %s955_s17 }
   0x8   : > { %s36_s22 = sadd.s32 1, %s939_s13  ;;  %p43_p1 = scmp.ne.s32.totalorder %s939_s13, %s935_s12 }
   0x9   : > { %s1253_s20 = smov (%p25_p0, %s24_s20), 0  ;;  %s1255_s21 = smov (!%p25_p0, %s27_s21), %s955_s17 }
   0xa   : > { %s32_s23 = ssub.s32 %s951_s16, %s1253_s20  ;;  %p44_p2 = scmp.eq.s32.totalorder %s959_s18, 0 }
   0xb   : > { %p29_p3 = scmp.ge.s32.totalorder %s1255_s21, 4  ;;  %p49_p4 = scmp.ne.s32.totalorder %s935_s12, %s931_s11 }
   0xc   : > { %p1074_p5 = por %p44_p2, %p43_p1  ;;  %p50_p6 = scmp.eq.s32.totalorder %s599_s19, 0 }
   0xd   : > { %s1257_s21 = smov (%p29_p3, %s1255_s21), 0  ;;  %s88_s26 = sadd.s32 1, %s927_s10 }
   0xe   : > { %p1080_p7 = por %p50_p6, %p49_p4  ;;  %s31_s27 = ssub.s32 %s955_s17, %s1257_s21 }
   0xf   : > { %p98_p8 = scmp.ne.s32.totalorder %s927_s10, %s923_s9  ;;  %s33_s28 = sor.u32 %s32_s23, %s31_s27 }
  0x10   : > { %p86_p9 = scmp.eq.s32.totalorder %s31_s27, 0  ;;  %p34_p10 = scmp.eq.s32.totalorder %s33_s28, 0 }
  0x11   : > { %p99_p11 = scmp.eq.s32.totalorder %s599_s19, 15  ;;  %p602_p13 = scmp.ge.s32.totalorder %s959_s18, 16 }
  0x12   : > { %s1090_s29 = scalar_select %p86_p9, %s927_s10, %s88_s26  }
  0x13   : > { %s1093_s30 = scalar_select %p34_p10, %s939_s13, %s36_s22  }
  0x14   : > { %p1095_p12 = por %p99_p11, %p98_p8  ;;  %121 = sbr.rel (%p602_p13) target bundleno = 64 (0x40), region = 16 }
  0x1b   : > { %124 = sbr.rel (!%p1074_p5) target bundleno = 64 (0x40), region = 20  ;;  %s125_s4 = sand.u32 (%p1074_p5), 1, %s939_s13  }
  0x1c   : > { %s604_s5 = sshll.u32 (%p1074_p5), %s955_s17, 1  ;;  %s603_s6 = sshll.u32 (%p1074_p5), %s125_s4, 4 }
  0x1d   : > { %s131_s7 = ssub.s32 (%p1074_p5), 7, %s604_s5  ;;  %s1107_s19 = scalar_lea.sflag (%p1074_p5), [#allocation4], %s125_s4 }
  0x1e   : > { %p132_p0 = scmp.lt.s32.totalorder (%p1074_p5), %s131_s7, 2  ;;  %s129_s22 = scalar_lea.vmem (%p1074_p5), [#allocation3], %s603_s6 }
  0x22   : > { %s1259_s7 = smov (!%p132_p0, %s131_s7), 2 }
  0x23   : > { %s1104_s8 = sshll.u32 %s1259_s7, 7 }
  0x24   : > { %s136_s11 = ssub.s32 256, %s1104_s8 }
  0x25   : > { %137 = vsyncadd %s1107_s19, %s136_s11  ;;  %p606_p1 = scmp.ne.s32.totalorder %s1104_s8, 0  ;;  %s644_s23 = sshll.u32 %s955_s17, 3 }
  0x26   : > { %s140_s24 = sadd.s32 %s951_s16, %s644_s23  ;;  %s144_s26 = sshll.u32 %s129_s22, 4  ;;  %s1113_s26 = int_to_ptr.vmem [resolvable:$true] %s144_s26 }
  0x27   : > { %s608_s27 = sshll.u32 %s140_s24, 7  ;;  %s821_s22 = scalar_lea.hbm %s1237_s0, 3584 }
  0x28   : > { %s1118_s4 = scalar_lea.hbm %s1237_s0, %s608_s27 }
  0x29   : > { %s817_s6 = scalar_lea.hbm %s1118_s4, %s1104_s8  ;;  %p822_p5 = scmp.lt.u32.totalorder %s1118_s4, %s1237_s0 }
  0x2a   : > { %p818_p2 = scmp.ne.s32.totalorder %s1118_s4, %s817_s6  ;;  %p823_p6 = scmp.lt.u32.totalorder %s821_s22, %s817_s6 }
  0x2b   : > { %p825_p9 = scmp.lt.u32.totalorder %s817_s6, %s1118_s4 }
  0x2c   : > { %p819_p3 = pnand %p818_p2, %p606_p1  ;;  %p824_p8 = por %p823_p6, %p822_p5 }
  0x2e   : > { %p820_p4 = pneg %p819_p3  ;;  %p826_p10 = por %p825_p9, %p824_p8 }
  0x30   : > { %p827_p11 = pnand %p826_p10, %p820_p4 }
  0x32   : > { %830 = shalt.err (!%p827_p11)
}
  0x33   : > { %s831_s27 = scalar_lea.vmem %s1113_s26, %s1104_s8  ;;  %s993_s28 = smov [#allocation3]  }
  0x34   : > { %p832_p13 = scmp.ne.s32.totalorder %s1113_s26, %s831_s27  ;;  %s835_s5 = sshll.u32 %s993_s28, 4  ;;  %s836_s5 = int_to_ptr.vmem [resolvable:$false] %s835_s5 }
  0x35   : > { %s837_s7 = scalar_lea.vmem %s836_s5, 512  ;;  %p838_p3 = scmp.lt.s32.totalorder %s1113_s26, %s836_s5 }
  0x36   : > { %p833_p0 = pnand %p832_p13, %p606_p1  ;;  %p839_p5 = scmp.lt.s32.totalorder %s837_s7, %s831_s27 }
  0x38   : > { %p834_p2 = pneg %p833_p0  ;;  %p840_p6 = por %p839_p5, %p838_p3 }
  0x3a   : > { %p841_p8 = pnand %p840_p6, %p834_p2 }
  0x3c   : > { %844 = shalt.err (!%p841_p8)
}
  0x3d   : > { %s994_s6 = smov 512   ;;  %s995_s11 = smov 128  }
  0x3e   : > { %s996_s22 = smov 8  }
  0x3f   : > { %150 = dma.hbm_to_vmem [thread:$0]  (%p606_p1), %s1118_s4, %s1104_s8, %s1113_s26, %s1107_s19, %s994_s6, %s995_s11, %s996_s22  }
  0x40 PF: > { %p611_p4 = scmp.ge.s32.totalorder %s959_s18, 1  ;;  %p169_p9 = scmp.lt.s32.totalorder %s959_s18, 17 }
  0x42   : > { %p170_p10 = pnand %p611_p4, %p169_p9 }
  0x43   : > { %s175_s23 = sand.u32 (!%p170_p10), 1, %s935_s12  }
  0x44   : > { %173 = sbr.rel (%p170_p10) target bundleno = 344 (0x158), region = 28  ;;  %s612_s24 = sshll.u32 (!%p170_p10), %s175_s23, 4 }
  0x45   : > { %s176_s27 = scalar_lea.sflag (!%p170_p10), [#allocation4], %s175_s23  ;;  %s179_s28 = scalar_lea.vmem (!%p170_p10), [#allocation3], %s612_s24 }
  0x4b   : > { %918 = dma.done.wait (%p1080_p7), %s176_s27, 256  }
  0x4c   : > { %920 = vsyncadd (%p1080_p7), %s176_s27, 4294967040  ;;  %s205_s8 = sand.u32 1, %s923_s9   ;;  %s1154_s19 = sshll.u32 %s947_s15, 1 }
  0x4d   : > { %s613_s26 = sshll.u32 %s205_s8, 4  ;;  %p218_p1 = scmp.lt.s32.totalorder %s1154_s19, 6 }
  0x4e   : > { %s1163_s22 = scalar_lea.vmem [#allocation5], %s613_s26   ;;  %p616_p7 = scmp.ne.s32.totalorder %s943_s14, 0 }
  0x4f   : > { %s219_s4 = scalar_select %p218_p1, %s1154_s19, 6 }
  0x50   : > { %235 = sbr.rel (%p616_p7) target bundleno = 87 (0x57), region = 36  ;;  %vm236_vm0 = vcmask (!%p616_p7), 7168   ;;  %v997_v0 = vmov (!%p616_p7), 0.0  }
  0x51   : > { %s615_s5 = sshll.u32 %s219_s4, 3  ;;  %237 = vst.msk [vmem:[#allocation2] sm:$0xff] (!%p616_p7), %vm236_vm0, %v997_v0  ;;  %238 = vst.msk [vmem:[#allocation2 + $0x8] sm:$0xff] (!%p616_p7), %vm236_vm0, %v997_v0 }
  0x52   : > { %s1161_s11 = scalar_lea.vmem %s1238_s1, %s615_s5 }
  0x57 PF: > { %v239_v1 = vld [vmem:[%s179_s28] sm:$0xff]  ;;  %v240_v2 = vld [vmem:[%s179_s28 + $0x8] sm:$0xff]  ;;  %v245_v3 = vlaneseq  ;;  %s619_s9 = sshll.u32 %s943_s14, 7  ;;  %vm265_vm2 = vcmask 7168   ;;  %p620_p11 = scmp.ne.s32.totalorder %s943_s14, 3 }
  0x58   : > { %v241_v4 = vmul.f32 45.0, %v239_v1  ;;  %v242_v5 = vmul.f32 45.0, %v240_v2  ;;  %v248_v6 = vstv %s619_s9  ;;  %v253_v17 = vld [vmem:[#allocation2] sm:$0xff]  ;;  %v254_v20 = vld [vmem:[#allocation2 + $0x8] sm:$0xff] }
  0x59   : > { %v246_v7 = vand.u32 127, %v245_v3  ;;  %v272_v23 = vld [vmem:[%s1161_s11] sm:$0xff] (!%p620_p11)  ;;  %v273_v24 = vld [vmem:[%s1161_s11 + $0x8] sm:$0xff] (!%p620_p11) }
  0x5a   : > { %v617_v8 = vadd.f32 -45.0, %v241_v4  ;;  %v618_v9 = vadd.f32 -45.0, %v242_v5  ;;  %v274_v25 = vmul.f32 (!%p620_p11), %v272_v23, %v272_v23  ;;  %v275_v26 = vmul.f32 (!%p620_p11), %v273_v24, %v273_v24 }
  0x5b   : > { %v249_v10 = vadd.s32 %v248_v6, %v246_v7  ;;  %v308_v33 = vmul.f32 (!%p620_p11), 45.0, %v272_v23  ;;  %v309_v34 = vmul.f32 (!%p620_p11), 45.0, %v273_v24  ;;  %v296_v43 = vmul.f32 (!%p620_p11), 0.87758255, %v272_v23 }
  0x5c   : > { %v276_v27 = vsub.f32 (!%p620_p11), 1.0, %v274_v25  ;;  %v277_v28 = vsub.f32 (!%p620_p11), 1.0, %v275_v26  ;;  %v297_v47 = vmul.f32 (!%p620_p11), 0.87758255, %v273_v24  ;;  %vm302_vm7 = vcmp.gt.f32.partialorder (!%p620_p11), %v272_v23, -0.87758255 }
  0x5d   : > { %vm250_vm1 = vcmp.lt.s32.totalorder %v249_v10, 500  ;;  %v623_v40 = vadd.f32 (!%p620_p11), -45.0, %v308_v33  ;;  %v624_v44 = vadd.f32 (!%p620_p11), -45.0, %v309_v34  ;;  %v621_v49 = vadd.f32 (!%p620_p11), -0.23971277, %v272_v23 }
  0x5e   : > { %v251_v11 = vsel %vm250_vm1, %v617_v8, -1e+30  ;;  %v252_v12 = vsel %vm250_vm1, %v618_v9, -1e+30  ;;  %v278_v29 = vmax.f32 (!%p620_p11), %v276_v27, 0.0  ;;  %v279_v30 = vmax.f32 (!%p620_p11), %v277_v28, 0.0 }
  0x5f   : > { %v255_v13 = vmul.f32 1.442695, %v251_v11  ;;  %v257_v14 = vmul.f32 1.442695, %v252_v12  ;;  %v312_v51 = vmul.f32 (!%p620_p11), 1.442695, %v623_v40 }
  0x60   : > { %v280_v31 = vmin.f32 (!%p620_p11), %v278_v29, 1.0  ;;  %v281_v32 = vmin.f32 (!%p620_p11), %v279_v30, 1.0  ;;  %v622_v53 = vadd.f32 (!%p620_p11), -0.23971277, %v273_v24  ;;  %vm303_vm8 = vcmp.gt.f32.partialorder (!%p620_p11), %v273_v24, -0.87758255 }
  0x61   : > { %797 = vpow2.f32 %v255_v13  ;;  %v314_v55 = vmul.f32 (!%p620_p11), 1.442695, %v624_v44 }
  0x62   : > { %799 = vpow2.f32 %v257_v14  ;;  %vm284_vm3 = vcmp.eq.f32.partialorder (!%p620_p11), %v280_v31, inf  ;;  %v287_v36 = vand.u32 (!%p620_p11), 2147483648, %v280_v31  ;;  %vm286_vm4 = vcmp.eq.f32.partialorder (!%p620_p11), %v280_v31, 0.0 }
  0x63   : > { %801 = vrsqrt.f32 (!%p620_p11), %v280_v31  ;;  %vm291_vm5 = vcmp.eq.f32.partialorder (!%p620_p11), %v281_v32, inf  ;;  %v294_v39 = vand.u32 (!%p620_p11), 2147483648, %v281_v32  ;;  %vm293_vm6 = vcmp.eq.f32.partialorder (!%p620_p11), %v281_v32, 0.0 }
  0x64   : > { %803 = vrsqrt.f32 (!%p620_p11), %v281_v32 }
  0x65   : > { %805 = vpow2.f32 (!%p620_p11), %v312_v51 }
  0x66   : > { %807 = vpow2.f32 (!%p620_p11), %v314_v55 }
  0x6b   : > { %v798_v15 = vpop.eup %797 }
  0x6c   : > { %259 = vadd.xlane.f32.xlu0 %v798_v15  ;;  %v800_v16 = vpop.eup %799 }
  0x6d   : > { %v802_v35 = vpop.eup (!%p620_p11), %801 }
  0x6e   : > { %v804_v37 = vpop.eup (!%p620_p11), %803  ;;  %v283_v38 = vmul.f32 (!%p620_p11), %v802_v35, %v280_v31 }
  0x6f   : > { %v290_v41 = vmul.f32 (!%p620_p11), %v804_v37, %v281_v32  ;;  %v806_v1 = vpop.eup (!%p620_p11), %805 }
  0x70   : > { %261 = vadd.xlane.f32.xlu0 %v800_v16  ;;  %v285_v42 = vsel (!%p620_p11), %vm284_vm3, %v280_v31, %v283_v38  ;;  %v808_v3 = vpop.eup (!%p620_p11), %807 }
  0x71   : > { %v288_v45 = vsel (!%p620_p11), %vm286_vm4, %v287_v36, %v285_v42  ;;  %v292_v46 = vsel (!%p620_p11), %vm291_vm5, %v281_v32, %v290_v41 }
  0x72   : > { %v298_v48 = vmul.f32 (!%p620_p11), 0.47942555, %v288_v45  ;;  %v295_v50 = vsel (!%p620_p11), %vm293_vm6, %v294_v39, %v292_v46 }
  0x73   : > { %v299_v52 = vmul.f32 (!%p620_p11), 0.47942555, %v295_v50 }
  0x74   : > { %v300_v54 = vsub.f32 (!%p620_p11), %v296_v43, %v298_v48 }
  0x75   : > { %v301_v56 = vsub.f32 (!%p620_p11), %v297_v47, %v299_v52 }
  0x76   : > { %v306_v57 = vsel (!%p620_p11), %vm302_vm7, %v300_v54, %v621_v49 }
  0x77   : > { %v316_v58 = vmul.f32 (!%p620_p11), 45.0, %v306_v57  ;;  %v307_v59 = vsel (!%p620_p11), %vm303_vm8, %v301_v56, %v622_v53 }
  0x78   : > { %v317_v60 = vmul.f32 (!%p620_p11), 45.0, %v307_v59 }
  0x79   : > { %v625_v61 = vadd.f32 (!%p620_p11), -45.0, %v316_v58 }
  0x7a   : > { %v626_v62 = vadd.f32 (!%p620_p11), -45.0, %v317_v60 }
  0x7b   : > { %v320_v63 = vmul.f32 (!%p620_p11), 1.442695, %v625_v61 }
  0x7c   : > { %v322_v0 = vmul.f32 (!%p620_p11), 1.442695, %v626_v62 }
  0x7d   : > { %809 = vpow2.f32 (!%p620_p11), %v320_v63 }
  0x7e   : > { %811 = vpow2.f32 (!%p620_p11), %v322_v0 }
  0x87   : > { %v810_v7 = vpop.eup (!%p620_p11), %809 }
  0x88   : > { %v812_v8 = vpop.eup (!%p620_p11), %811  ;;  %v330_v10 = vmax.f32 (!%p620_p11), %v810_v7, 1e-37 }
  0x89   : > { %v331_v12 = vmax.f32 (!%p620_p11), %v812_v8, 1e-37 }
  0xf9   : > { %v260_v18 = vpop.xlane.xlu0 %259 }
  0xfa   : > { %v263_v19 = vadd.f32 %v260_v18, %v253_v17  ;;  %271 = sbr.rel (%p620_p11) target bundleno = 288 (0x120), region = 40 }
  0xfc   : > { %266 = vst.msk [vmem:[#allocation2] sm:$0xff] %vm265_vm2, %v263_v19 }
  0xfd   : > { %v262_v21 = vpop.xlane.xlu0 %261 }
  0xfe   : > { %v264_v22 = vadd.f32 %v262_v21, %v254_v20 }
 0x100   : > { %267 = vst.msk [vmem:[#allocation2 + $0x8] sm:$0xff] %vm265_vm2, %v264_v22 }
 0x103   : > { %v324_v2 = vld [vmem:[#allocation2] sm:$0xff] }
 0x104   : > { %v326_v5 = vsub.f32 %v324_v2, %v806_v1 }
 0x106   : > { %v328_v9 = vadd.f32 %v810_v7, %v326_v5 }
 0x107   : > { %v325_v4 = vld [vmem:[#allocation2 + $0x8] sm:$0xff] }
 0x108   : > { %v327_v6 = vsub.f32 %v325_v4, %v808_v3  ;;  %v332_v13 = vmax.f32 %v328_v9, %v330_v10 }
 0x10a   : > { %v329_v11 = vadd.f32 %v812_v8, %v327_v6  ;;  %813 = vlog2.f32 %v332_v13 }
 0x10c   : > { %v333_v14 = vmax.f32 %v329_v11, %v331_v12 }
 0x10e   : > { %815 = vlog2.f32 %v333_v14 }
 0x114   : > { %v814_v15 = vpop.eup %813 }
 0x115   : > { %v335_v17 = vmul.f32 0.6931472, %v814_v15 }
 0x117   : > { %v338_v19 = vadd.f32 45.0, %v335_v17 }
 0x118   : > { %v816_v16 = vpop.eup %815 }
 0x119   : > { %v337_v18 = vmul.f32 0.6931472, %v816_v16  ;;  %v340_v21 = vsub.f32 %v338_v19, %v316_v58 }
 0x11b   : > { %v339_v20 = vadd.f32 45.0, %v337_v18  ;;  %342 = vst.msk [vmem:[%s1163_s22] sm:$0xff] %vm265_vm2, %v340_v21 }
 0x11d   : > { %v341_v22 = vsub.f32 %v339_v20, %v317_v60 }
 0x11f   : > { %343 = vst.msk [vmem:[%s1163_s22 + $0x8] sm:$0xff] %vm265_vm2, %v341_v22 }
 0x120 PF: > { %350 = sbr.rel (!%p1095_p12) target bundleno = 344 (0x158), region = 44  ;;  %s352_s14 = ssub.s32 (%p1095_p12), 7, %s1154_s19 }
 0x121   : > { %s645_s25 = sshll.u32 (%p1095_p12), %s947_s15, 4  ;;  %p353_p13 = scmp.lt.s32.totalorder (%p1095_p12), %s352_s14, 2 }
 0x122   : > { %s1183_s27 = scalar_lea.vmem (%p1095_p12), %s1239_s2, %s645_s25  }
 0x127   : > { %s1261_s14 = smov (!%p353_p13, %s352_s14), 2 }
 0x128   : > { %s629_s28 = sshll.u32 %s1261_s14, 7 }
 0x129   : > { %p632_p0 = scmp.eq.s32.totalorder %s629_s28, 0 }
 0x12a   : > { %s1189_s8 = sshrl.u32 (!%p632_p0), %s1261_s14, 1 }
 0x12b   : > { %361 = sbr.rel (%p632_p0) target bundleno = 344 (0x158), region = 48  ;;  %p633_p12 = scmp.le.s32.totalorder (!%p632_p0), %s1189_s8, 0 }
 0x132   : > { %535 = sbr.rel (%p633_p12) target bundleno = 323 (0x143), region = 133  ;;  %s961_s15 = smov (!%p633_p12), %s1183_s27  }
 0x133   : > { %s965_s3 = smov (!%p633_p12), %s1163_s22   ;;  %s969_s19 = smov (!%p633_p12), 0  }
 0x134   : > { %s973_s26 = smov (!%p633_p12), 0  }
 0x139 LB: >> { %v425_v23 = vld [vmem:[%s967_s3] sm:$0xff]  ;;  %v427_v24 = vld [vmem:[%s967_s3 + $0x8] sm:$0xff]  ;;  %s429_s4 = sadd.s32 1, %s971_s19  ;;  %s419_s26 = sadd.s32 1, %s975_s26   ;;  %s975_s26 = sphi %s973_s26, %s419_s26   ;;  %s971_s19 = sphi %s969_s19, %s970_s19   ;;  %s967_s3 = sphi %s965_s3, %s434_s3   ;;  %s963_s15 = sphi %s961_s15, %s435_s15  }
 0x13a   : >> { %426 = vst [vmem:[%s963_s15] sm:$0xff] %v425_v23  ;;  %428 = vst [vmem:[%s963_s15 + $0x8] sm:$0xff] %v427_v24  ;;  %p430_p2 = scmp.ge.s32.totalorder %s429_s4, %s1189_s8  ;;  %p418_p3 = scmp.ge.s32.totalorder %s419_s26, %s1189_s8 }
 0x13c   : >> { %s1263_s4 = smov (%p430_p2, %s429_s4), 0  ;;  %421 = sbr.rel (!%p418_p3) target bundleno = 313 (0x139), region = 139 }
 0x13d   : >> { %s634_s5 = sshll.u32 %s1263_s4, 4  ;;  %s970_s19 = smov %s1263_s4  }
 0x13e   : >> { %s434_s3 = scalar_lea.vmem %s1163_s22, %s634_s5 [#allocation5]   ;;  %s435_s15 = scalar_lea.vmem %s1183_s27, %s634_s5  }
 0x143 PF: > { %s1199_s7 = sand.u32 1, %s1261_s14   ;;  %s646_s6 = sshll.u32 %s1189_s8, 4 }
 0x144   : > { %s440_s11 = scalar_lea.vmem %s1163_s22, %s646_s6 [#allocation5]   ;;  %s442_s9 = scalar_lea.vmem %s1183_s27, %s646_s6  }
 0x145   : > { %p639_p5 = scmp.le.s32.totalorder %s1199_s7, 0 }
 0x146   : > { %s977_s25 = smov (!%p639_p5), %s442_s9   ;;  %s981_s23 = smov (!%p639_p5), %s440_s11  }
 0x147   : > { %549 = sbr.rel (%p639_p5) target bundleno = 344 (0x158), region = 144  ;;  %s985_s24 = smov (!%p639_p5), 0  }
 0x148   : > { %s989_s28 = smov (!%p639_p5), 0  }
 0x14e LB: >> { %v452_v25 = vld [vmem:[%s983_s23] sm:$0xff]  ;;  %s454_s14 = sadd.s32 1, %s987_s24  ;;  %s446_s28 = sadd.s32 1, %s991_s28   ;;  %s991_s28 = sphi %s989_s28, %s446_s28   ;;  %s987_s24 = sphi %s985_s24, %s986_s24   ;;  %s983_s23 = sphi %s981_s23, %s459_s23   ;;  %s979_s25 = sphi %s977_s25, %s460_s25  }
 0x14f   : >> { %453 = vst [vmem:[%s979_s25] sm:$0xff] %v452_v25  ;;  %p455_p6 = scmp.ge.s32.totalorder %s454_s14, %s1199_s7  ;;  %p445_p8 = scmp.ge.s32.totalorder %s446_s28, %s1199_s7 }
 0x151   : >> { %s1265_s14 = smov (%p455_p6, %s454_s14), 0  ;;  %448 = sbr.rel (!%p445_p8) target bundleno = 334 (0x14e), region = 150 }
 0x152   : >> { %s640_s22 = sshll.u32 %s1265_s14, 3  ;;  %s986_s24 = smov %s1265_s14  }
 0x153   : >> { %s459_s23 = scalar_lea.vmem %s440_s11, %s640_s22 [#allocation5]   ;;  %s460_s25 = scalar_lea.vmem %s442_s9, %s640_s22  }
 0x158 PF: > { %s15_s18 = sadd.s32 1, %s959_s18   ;;  %s1243_s9 = smov %s927_s10 }
 0x159   : > { %p12_p4 = scmp.ge.s32.totalorder %s15_s18, 18   ;;  %s1244_s10 = smov %s1090_s29 }
 0x15a   : > { %s1245_s11 = smov %s935_s12  ;;  %s1246_s12 = smov %s939_s13 }
 0x15b   : > { %s1247_s13 = smov %s1093_s30  ;;  %s1248_s14 = smov %s951_s16 }
 0x15c   : > { %s1249_s15 = smov %s955_s17  ;;  %s1250_s16 = smov %s1253_s20 }
 0x15d   : > { %s1251_s17 = smov %s1257_s21  ;;  %14 = sbr.rel (!%p12_p4) target bundleno = 6 (0x6), region = 161 }
 0x164   :  { %476 = vsyncpa [#allocation4], 1 }
 0x165   :  { %478 = vsyncpa [#allocation4 + $0x1], 1 }

</bundles_post_ra>
